<compile_context>
chip_gen: v6e
topology: v6e:2x2x1
jax: 0.10.0
libtpu: 0.0.40
codegen_flags: <defaults>
</compile_context>

<pallas_src>
import jax
import jax.numpy as jnp
from jax.experimental import pallas as pl
from jax.experimental.pallas import tpu as pltpu


def critic_kernel(s_ref, a_ref, w1_ref, b1_ref, w2_ref, b2_ref,
                  w3_ref, b3_ref, o_ref):
    # Fused concat on the lane axis: [tb, Ds] ++ [tb, Da] -> [tb, Ds+Da].
    x = jnp.concatenate([s_ref[...], a_ref[...]], axis=-1)
    x = x.astype(jnp.bfloat16)

    # fc1: one MXU pass over the fused K = Ds+Da, f32 accumulation.
    h1 = jnp.dot(x, w1_ref[...], preferred_element_type=jnp.float32) + b1_ref[...]
    h1 = jnp.maximum(h1, 0.0)

    # fc2
    h2 = jnp.dot(h1.astype(jnp.bfloat16), w2_ref[...],
                 preferred_element_type=jnp.float32) + b2_ref[...]
    h2 = jnp.maximum(h2, 0.0)

    # fc3: single output column -> per-lane multiply + cross-lane reduce
    # (VPU/XLU) instead of a 1-column MXU pass.  b3 is an SMEM scalar.
    w3_row = w3_ref[...].astype(jnp.float32)               # [1, H2]
    q = jnp.sum(h2 * w3_row, axis=-1, keepdims=True) + b3_ref[0]
    o_ref[...] = q.astype(o_ref.dtype)


def pack_critic_params(w1, b1, w2, b2, w3, b3):
    """Cast weights to bf16 once (outside the per-step path) and lay out
    biases / w3 the way the kernel wants them."""
    bf = jnp.bfloat16
    return dict(
        w1=w1.astype(bf),                                  # [Ds+Da, 400]
        b1=b1.reshape(1, -1).astype(jnp.float32),          # [1, 400]
        w2=w2.astype(bf),                                  # [400, 300]
        b2=b2.reshape(1, -1).astype(jnp.float32),          # [1, 300]
        w3=w3.reshape(1, -1).astype(bf),                   # [1, 300] lane-major
        b3=b3.reshape(-1).astype(jnp.float32),             # (1,) SMEM scalar
    )


def _round_up(x, m):
    return ((x + m - 1) // m) * m


def critic_forward(state, action, p, *, tile_b=1024):
    """state: [B, state_dim] f32, action: [B, action_dim] f32 -> q: [B, 1] f32."""
    B, Ds = state.shape
    Da = action.shape[1]
    H1 = p["w1"].shape[1]
    H2 = p["w2"].shape[1]

    # Batch tile:
    #  - tiny batches: single full-batch tile (launch-bound regime anyway).
    #  - large batches: tiles of up to `tile_b` rows (multiple of 8), sized so
    #    the grid has >= 2 steps so the "parallel" axis can shard across
    #    v7x's two TensorCores.  Weights use constant index_maps and stay
    #    VMEM-resident across all grid steps.
    if B <= 256:
        tb = B
    else:
        tb = min(tile_b, _round_up((B + 1) // 2, 8))
    grid = (pl.cdiv(B, tb),)

    row = lambda shape: pl.BlockSpec(shape, lambda i: (i, 0))    # batch-tiled
    fixed = lambda shape: pl.BlockSpec(shape, lambda i: (0, 0))  # VMEM-resident

    return pl.pallas_call(
        critic_kernel,
        out_shape=jax.ShapeDtypeStruct((B, 1), jnp.float32),
        grid=grid,
        in_specs=[
            row((tb, Ds)),                                       # state
            row((tb, Da)),                                       # action
            fixed((Ds + Da, H1)),                                # w1 (bf16, fused)
            fixed((1, H1)),                                      # b1 (f32)
            fixed((H1, H2)),                                     # w2 (bf16)
            fixed((1, H2)),                                      # b2 (f32)
            fixed((1, H2)),                                      # w3 row (bf16)
            pl.BlockSpec(memory_space=pltpu.MemorySpace.SMEM),   # b3 scalar
        ],
        out_specs=row((tb, 1)),
        compiler_params=pltpu.CompilerParams(
            dimension_semantics=("parallel",)),
    )(state, action, p["w1"], p["b1"], p["w2"], p["b2"], p["w3"], p["b3"])


def init_linear(key, fan_in, fan_out):
    # Matches torch.nn.Linear default init: U(-1/sqrt(fan_in), 1/sqrt(fan_in)).
    kw, kb = jax.random.split(key)
    bound = 1.0 / jnp.sqrt(jnp.float32(fan_in))
    w = jax.random.uniform(kw, (fan_in, fan_out), jnp.float32, -bound, bound)
    b = jax.random.uniform(kb, (fan_out,), jnp.float32, -bound, bound)
    return w, b


if __name__ == "__main__":
    key = jax.random.PRNGKey(0)

    state_dim, action_dim = 16, 8
    batch = 2

    k_s, k_a, k1, k2, k3 = jax.random.split(key, 5)
    state = jax.random.normal(k_s, (batch, state_dim), jnp.float32)
    action = jax.random.normal(k_a, (batch, action_dim), jnp.float32)

    w1, b1 = init_linear(k1, state_dim + action_dim, 400)
    w2, b2 = init_linear(k2, 400, 300)
    w3, b3 = init_linear(k3, 300, 1)

    params = pack_critic_params(w1, b1, w2, b2, w3, b3)

    q = critic_forward(state, action, params)
    q = jax.block_until_ready(q)

    # Plain-JAX reference at matching precision (bf16 weights / bf16 dot
    # operands, f32 accumulation and f32 elementwise), mirroring the kernel.
    bf = jnp.bfloat16
    x = jnp.concatenate([state, action], axis=1).astype(bf)
    h1 = jnp.maximum(
        jnp.dot(x, params["w1"], preferred_element_type=jnp.float32)
        + params["b1"], 0.0)
    h2 = jnp.maximum(
        jnp.dot(h1.astype(bf), params["w2"], preferred_element_type=jnp.float32)
        + params["b2"], 0.0)
    ref = (jnp.sum(h2 * params["w3"].astype(jnp.float32), axis=-1, keepdims=True)
           + params["b3"].reshape(1, 1))

    assert q.shape == (batch, 1)
    assert jnp.allclose(q, ref, atol=1e-3, rtol=1e-3)

    print("KERNEL_OK")
</pallas_src>

<mosaic_0001>
module attributes {stable_mosaic.version = 11 : i64} {
  func.func @critic_kernel(%arg0: i32, %arg1: memref<2x16xf32, #tpu.memory_space<vmem>>, %arg2: memref<2x8xf32, #tpu.memory_space<vmem>>, %arg3: memref<24x400xbf16, #tpu.memory_space<vmem>>, %arg4: memref<1x400xf32, #tpu.memory_space<vmem>>, %arg5: memref<400x300xbf16, #tpu.memory_space<vmem>>, %arg6: memref<1x300xf32, #tpu.memory_space<vmem>>, %arg7: memref<1x300xbf16, #tpu.memory_space<vmem>>, %arg8: memref<1xf32, #tpu.memory_space<smem>>, %arg9: memref<2x1xf32, #tpu.memory_space<vmem>>) attributes {dimension_semantics = [#tpu.dimension_semantics<parallel>], iteration_bounds = array<i64: 1>, scalar_prefetch = 0 : i64, scratch_operands = 0 : i64, tpu.core_type = #tpu.core_type<tc>, window_params = [{transform_indices = @transform_0, window_bounds = array<i64: 2, 16>}, {transform_indices = @transform_1, window_bounds = array<i64: 2, 8>}, {pipeline_mode = #tpu.pipeline_mode<synchronous>, transform_indices = @transform_2, window_bounds = array<i64: 24, 400>}, {pipeline_mode = #tpu.pipeline_mode<synchronous>, transform_indices = @transform_3, window_bounds = array<i64: 1, 400>}, {pipeline_mode = #tpu.pipeline_mode<synchronous>, transform_indices = @transform_4, window_bounds = array<i64: 400, 300>}, {pipeline_mode = #tpu.pipeline_mode<synchronous>, transform_indices = @transform_5, window_bounds = array<i64: 1, 300>}, {pipeline_mode = #tpu.pipeline_mode<synchronous>, transform_indices = @transform_6, window_bounds = array<i64: 1, 300>}, {transform_indices = @transform_7, window_bounds = array<i64: 1>}, {transform_indices = @transform_8, window_bounds = array<i64: 2, 1>}]} {
    %c0 = arith.constant 0 : index
    %c0_0 = arith.constant 0 : index
    %0 = vector.load %arg1[%c0, %c0_0] : memref<2x16xf32, #tpu.memory_space<vmem>>, vector<2x16xf32>
    %c0_1 = arith.constant 0 : index
    %c0_2 = arith.constant 0 : index
    %1 = vector.load %arg2[%c0_1, %c0_2] : memref<2x8xf32, #tpu.memory_space<vmem>>, vector<2x8xf32>
    %2 = tpu.concatenate %0, %1 in 1 : vector<2x16xf32>, vector<2x8xf32> -> vector<2x24xf32>
    %3 = arith.truncf %2 : vector<2x24xf32> to vector<2x24xbf16>
    %c0_3 = arith.constant 0 : index
    %c0_4 = arith.constant 0 : index
    %4 = vector.load %arg3[%c0_3, %c0_4] : memref<24x400xbf16, #tpu.memory_space<vmem>>, vector<24x400xbf16>
    %cst = arith.constant dense<0.000000e+00> : vector<2x400xf32>
    %5 = tpu.matmul %3, %4, %cst {dimension_numbers = #tpu.dot_dimension_numbers<[1], [0], [0], [1], [0, 0, 1, 1], [], []>} : vector<2x24xbf16>, vector<24x400xbf16>, vector<2x400xf32> -> vector<2x400xf32>
    %c0_5 = arith.constant 0 : index
    %c0_6 = arith.constant 0 : index
    %6 = vector.load %arg4[%c0_5, %c0_6] : memref<1x400xf32, #tpu.memory_space<vmem>>, vector<1x400xf32>
    %7 = vector.broadcast %6 : vector<1x400xf32> to vector<2x400xf32>
    %8 = arith.addf %5, %7 : vector<2x400xf32>
    %cst_7 = arith.constant 0.000000e+00 : f32
    %9 = vector.broadcast %cst_7 : f32 to vector<2x400xf32>
    %10 = arith.maximumf %8, %9 : vector<2x400xf32>
    %11 = arith.truncf %10 : vector<2x400xf32> to vector<2x400xbf16>
    %c0_8 = arith.constant 0 : index
    %c0_9 = arith.constant 0 : index
    %12 = vector.load %arg5[%c0_8, %c0_9] : memref<400x300xbf16, #tpu.memory_space<vmem>>, vector<400x300xbf16>
    %cst_10 = arith.constant dense<0.000000e+00> : vector<2x300xf32>
    %13 = tpu.matmul %11, %12, %cst_10 {dimension_numbers = #tpu.dot_dimension_numbers<[1], [0], [0], [1], [0, 0, 1, 1], [], []>} : vector<2x400xbf16>, vector<400x300xbf16>, vector<2x300xf32> -> vector<2x300xf32>
    %c0_11 = arith.constant 0 : index
    %c0_12 = arith.constant 0 : index
    %14 = vector.load %arg6[%c0_11, %c0_12] : memref<1x300xf32, #tpu.memory_space<vmem>>, vector<1x300xf32>
    %15 = vector.broadcast %14 : vector<1x300xf32> to vector<2x300xf32>
    %16 = arith.addf %13, %15 : vector<2x300xf32>
    %cst_13 = arith.constant 0.000000e+00 : f32
    %17 = vector.broadcast %cst_13 : f32 to vector<2x300xf32>
    %18 = arith.maximumf %16, %17 : vector<2x300xf32>
    %c0_14 = arith.constant 0 : index
    %c0_15 = arith.constant 0 : index
    %19 = vector.load %arg7[%c0_14, %c0_15] : memref<1x300xbf16, #tpu.memory_space<vmem>>, vector<1x300xbf16>
    %20 = arith.extf %19 : vector<1x300xbf16> to vector<1x300xf32>
    %21 = vector.broadcast %20 : vector<1x300xf32> to vector<2x300xf32>
    %22 = arith.mulf %18, %21 : vector<2x300xf32>
    %cst_16 = arith.constant dense<0.000000e+00> : vector<2xf32>
    %23 = vector.multi_reduction <add>, %22, %cst_16 [1] : vector<2x300xf32> to vector<2xf32>
    %24 = vector.shape_cast %23 : vector<2xf32> to vector<2x1xf32>
    %c0_17 = arith.constant 0 : index
    %25 = memref.load %arg8[%c0_17] : memref<1xf32, #tpu.memory_space<smem>>
    %26 = vector.broadcast %25 : f32 to vector<2x1xf32>
    %27 = arith.addf %24, %26 : vector<2x1xf32>
    %c0_18 = arith.constant 0 : index
    %c0_19 = arith.constant 0 : index
    %28 = vector.load %arg9[%c0_18, %c0_19] : memref<2x1xf32, #tpu.memory_space<vmem>>, vector<2x1xf32>
    tpu.vector_store %arg9[%c0_18, %c0_19], %27 {strides = array<i32>} : memref<2x1xf32, #tpu.memory_space<vmem>>, vector<2x1xf32>,
    return
  }
  func.func @transform_0(%arg0: i32) -> (i32, i32) {
    %c0_i32 = arith.constant 0 : i32
    %c0_i32_0 = arith.constant 0 : i32
    return %arg0, %c0_i32 : i32, i32
  }
  func.func @transform_1(%arg0: i32) -> (i32, i32) {
    %c0_i32 = arith.constant 0 : i32
    %c0_i32_0 = arith.constant 0 : i32
    return %arg0, %c0_i32 : i32, i32
  }
  func.func @transform_2(%arg0: i32) -> (i32, i32) {
    %c0_i32 = arith.constant 0 : i32
    %c0_i32_0 = arith.constant 0 : i32
    %c0_i32_1 = arith.constant 0 : i32
    return %c0_i32, %c0_i32_0 : i32, i32
  }
  func.func @transform_3(%arg0: i32) -> (i32, i32) {
    %c0_i32 = arith.constant 0 : i32
    %c0_i32_0 = arith.constant 0 : i32
    %c0_i32_1 = arith.constant 0 : i32
    return %c0_i32, %c0_i32_0 : i32, i32
  }
  func.func @transform_4(%arg0: i32) -> (i32, i32) {
    %c0_i32 = arith.constant 0 : i32
    %c0_i32_0 = arith.constant 0 : i32
    %c0_i32_1 = arith.constant 0 : i32
    return %c0_i32, %c0_i32_0 : i32, i32
  }
  func.func @transform_5(%arg0: i32) -> (i32, i32) {
    %c0_i32 = arith.constant 0 : i32
    %c0_i32_0 = arith.constant 0 : i32
    %c0_i32_1 = arith.constant 0 : i32
    return %c0_i32, %c0_i32_0 : i32, i32
  }
  func.func @transform_6(%arg0: i32) -> (i32, i32) {
    %c0_i32 = arith.constant 0 : i32
    %c0_i32_0 = arith.constant 0 : i32
    %c0_i32_1 = arith.constant 0 : i32
    return %c0_i32, %c0_i32_0 : i32, i32
  }
  func.func @transform_7(%arg0: i32) -> i32 {
    %c0_i32 = arith.constant 0 : i32
    %c0_i32_0 = arith.constant 0 : i32
    return %c0_i32 : i32
  }
  func.func @transform_8(%arg0: i32) -> (i32, i32) {
    %c0_i32 = arith.constant 0 : i32
    %c0_i32_0 = arith.constant 0 : i32
    return %arg0, %c0_i32 : i32, i32
  }
}

</mosaic_0001>

<bundles_post_ra>
// kernel: tpu_custom_call.1
= control target key start
LH: loop header
LB: loop body
LE: loop exit
PB: predicated region body
PF: predicated region fallthrough
CT: control target
= control target key end

     0   :  { %14 = vsyncpa [#allocation4], 0  ;;  %s1441_s0 = inlined_call_operand.hbm [shape: f32[2,16], index: 0, kind: input, shape index: {}]   ;;  %s1442_s1 = inlined_call_operand.hbm [shape: f32[2,8], index: 1, kind: input, shape index: {}]   ;;  %s1443_s2 = inlined_call_operand.hbm [shape: bf16[24,400], index: 2, kind: input, shape index: {}]   ;;  %s1444_s3 = inlined_call_operand.vmem [shape: f32[1,400], index: 3, kind: input, shape index: {}]   ;;  %s1445_s4 = inlined_call_operand.hbm [shape: bf16[400,300], index: 4, kind: input, shape index: {}]   ;;  %s1446_s5 = inlined_call_operand.vmem [shape: f32[1,300], index: 5, kind: input, shape index: {}]   ;;  %s1447_s6 = inlined_call_operand.vmem [shape: bf16[1,300], index: 6, kind: input, shape index: {}]   ;;  %s1448_s7 = inlined_call_operand.<no memory space> [shape: f32[1], index: 7, kind: input, shape index: {}]   ;;  %s1449_s8 = inlined_call_operand.vmem [shape: f32[2,1], index: 8, kind: output, shape index: {}]  }
   0x1   :  { %15 = vsyncpa [#allocation6], 0 }
   0x2   :  { %16 = vsyncpa [#allocation9], 0  ;;  %s1311_s27 = smov [#allocation5]   ;;  %s1312_s29 = smov [#allocation3]  }
   0x3   :  { %s33_s28 = sshll.u32 %s1311_s27, 4  ;;  %s23_s30 = sshll.u32 %s1312_s29, 4  ;;  %s34_s28 = int_to_ptr.vmem [resolvable:$true] %s33_s28  ;;  %s24_s30 = int_to_ptr.vmem [resolvable:$true] %s23_s30 }
   0x4   :  { %s1233_s9 = scalar_lea.vmem %s34_s28, 32  ;;  %p1238_p1 = scmp.lt.s32.totalorder %s34_s28, %s34_s28 }
   0x5   :  { %p1234_p0 = scmp.ne.s32.totalorder %s34_s28, %s1233_s9  ;;  %p1239_p2 = scmp.lt.s32.totalorder %s1233_s9, %s1233_s9 }
   0x7   :  { %p1240_p3 = por %p1239_p2, %p1238_p1 }
   0x9   :  { %p1241_p4 = pnand %p1240_p3, %p1234_p0 }
   0xb   :  { %1244 = shalt.err (!%p1241_p4)
}
   0xc   :  { %36 = dma.hbm_to_vmem [thread:$0]  %s1442_s1, 32, %s34_s28, [#allocation6]  }
   0xd   :  { %s1253_s12 = scalar_lea.vmem %s24_s30, 32  ;;  %p1258_p6 = scmp.lt.s32.totalorder %s24_s30, %s24_s30 }
   0xe   :  { %p1254_p5 = scmp.ne.s32.totalorder %s24_s30, %s1253_s12  ;;  %p1259_p7 = scmp.lt.s32.totalorder %s1253_s12, %s1253_s12 }
  0x10   :  { %p1260_p8 = por %p1259_p7, %p1258_p6 }
  0x12   :  { %p1261_p9 = pnand %p1260_p8, %p1254_p5 }
  0x14   :  { %1264 = shalt.err (!%p1261_p9)
}
  0x15   :  { %26 = dma.hbm_to_vmem [thread:$0]  %s1441_s0, 32, %s24_s30, [#allocation4]  }
  0x16   :  { %s1313_s15 = smov [#allocation7]  }
  0x17   :  { %s42_s16 = sshll.u32 %s1313_s15, 4  ;;  %s43_s16 = int_to_ptr.vmem [resolvable:$true] %s42_s16 }
  0x18   :  { %s1273_s17 = scalar_lea.vmem %s43_s16, 768  ;;  %p1278_p11 = scmp.lt.s32.totalorder %s43_s16, %s43_s16 }
  0x19   :  { %p1274_p10 = scmp.ne.s32.totalorder %s43_s16, %s1273_s17  ;;  %p1279_p12 = scmp.lt.s32.totalorder %s1273_s17, %s1273_s17 }
  0x1b   :  { %p1280_p13 = por %p1279_p12, %p1278_p11 }
  0x1d   :  { %p1281_p0 = pnand %p1280_p13, %p1274_p10 }
  0x1f   :  { %1284 = shalt.err (!%p1281_p0)
}
  0x20   :  { %s1314_s1 = smov 256   ;;  %s1315_s18 = smov 16  }
  0x21   :  { %48 = dma.hbm_to_vmem [thread:$0]  %s1443_s2, 768, %s43_s16, [#allocation6], %s1314_s1, %s1314_s1, %s1315_s18  }
  0x22   :  { %s1316_s21 = smov [#allocation8]  }
  0x23   :  { %s56_s22 = sshll.u32 %s1316_s21, 4  ;;  %s57_s22 = int_to_ptr.vmem [resolvable:$true] %s56_s22 }
  0x24   :  { %s1293_s0 = scalar_lea.vmem %s57_s22, 9600  ;;  %p1298_p2 = scmp.lt.s32.totalorder %s57_s22, %s57_s22 }
  0x25   :  { %p1294_p1 = scmp.ne.s32.totalorder %s57_s22, %s1293_s0  ;;  %p1299_p3 = scmp.lt.s32.totalorder %s1293_s0, %s1293_s0 }
  0x27   :  { %p1300_p4 = por %p1299_p3, %p1298_p2 }
  0x29   :  { %p1301_p5 = pnand %p1300_p4, %p1294_p1 }
  0x2b   :  { %1304 = shalt.err (!%p1301_p5)
}
  0x2c   :  { %s1317_s23 = smov 192   ;;  %s1318_s24 = smov 12  }
  0x2d   :  { %62 = dma.hbm_to_vmem [thread:$0]  %s1445_s4, 9600, %s57_s22, [#allocation9], %s1317_s23, %s1317_s23, %s1318_s24  }
  0x2e   :  { %1305 = dma.done.wait [#allocation4], 32  }
  0x2f   :  { %1306 = vsyncadd [#allocation4], 4294967264 }
  0x30   :  { %1307 = dma.done.wait [#allocation6], 800  }
  0x31   :  { %1308 = vsyncadd [#allocation6], 4294966496 }
  0x32   :  { %1309 = dma.done.wait [#allocation9], 9600  }
  0x33   :  { %1310 = vsyncadd [#allocation9], 4294957696  ;;  %v1319_v0 = vmov 0   ;;  %v83_v1 = vld [vmem:[#allocation5] sm:$0x3]  ;;  %v95_v2 = vld [vmem:[#allocation7 + $0x20] sm:$0xff] }
  0x34   :  { %198 = vmatprep.mubr.bf16.mxu1 %v1319_v0  ;;  %vm153_vm0 = vcmask 1043456   ;;  %85 = vrot.lane.b32.xlu0 %v83_v1, %s1315_s18  ;;  %v1000_v3 = vcombine.high %v95_v2, %v95_v2  ;;  %v999_v4 = vcombine.low %v95_v2, %v95_v2  ;;  %v1117_v5 = vld [vmem:[#allocation7 + $0x4] ss:$16 sps:$4 sm:$0xff]   ;;  %v96_v6 = vld [vmem:[#allocation7 + $0x28] sm:$0xff]  ;;  %v1119_v8 = vld [vmem:[#allocation7] ss:$16 sps:$4 sm:$0xff]  }
  0x35   :  { %v1001_v9 = vcombine.low %v96_v6, %v96_v6  ;;  %v1125_v10 = vld [vmem:[#allocation8 + $0xac] ss:$12 sps:$4 sm:$0xff]   ;;  %v1002_v11 = vcombine.high %v96_v6, %v96_v6  ;;  %v1127_v13 = vld [vmem:[#allocation8 + $0xa8] ss:$12 sps:$4 sm:$0xff]   ;;  %v1130_v15 = vld [vmem:[#allocation8 + $0x90] ss:$12 sps:$4 sm:$0xff]   ;;  %v99_v6 = vlaneseq }
  0x36   :  { %1003 = vmatprep.subr.msk.bf16.mxu1 %vm153_vm0, %v1000_v3  ;;  %v155_v7 = vsel %vm153_vm0, %v999_v4, 0  ;;  %776 = vmatprep.subr.bf16.mxu0 %v1125_v10  ;;  %v1128_v14 = vld [vmem:[#allocation8 + $0x94] ss:$12 sps:$4 sm:$0xff]   ;;  %v1131_v16 = vld [vmem:[#allocation8 + $0x7c] ss:$12 sps:$4 sm:$0xff]   ;;  %vm88_vm1 = vcmask 130048  }
  0x37   :  { %179 = vmatpush1.bf16.msra.mxu1 %v155_v7  ;;  %v1381_v12 = vsel %vm153_vm0, %v1001_v9, 0  ;;  %777 = vmatpush1.bf16.msra.mxu0 %v1127_v13  ;;  %v1133_v17 = vld [vmem:[#allocation8 + $0x78] ss:$12 sps:$4 sm:$0xff]   ;;  %v1136_v19 = vld [vmem:[#allocation8 + $0x60] ss:$12 sps:$4 sm:$0xff]   ;;  %vm149_vm2 = vcmask 195584  }
  0x38   :  { %180 = vmatprep.subr.bf16.mxu1 %v1117_v5  ;;  %778 = vmatprep.subr.bf16.mxu0 %v1128_v14  ;;  %v1134_v18 = vld [vmem:[#allocation8 + $0x64] ss:$12 sps:$4 sm:$0xff]   ;;  %v1137_v20 = vld [vmem:[#allocation8 + $0x4c] ss:$12 sps:$4 sm:$0xff]   ;;  %v1139_v21 = vld [vmem:[#allocation8 + $0x48] ss:$12 sps:$4 sm:$0xff]  }
  0x39   :  { %v1140_v22 = vld [vmem:[#allocation8 + $0x34] ss:$12 sps:$4 sm:$0xff]   ;;  %v1142_v23 = vld [vmem:[#allocation8 + $0x30] ss:$12 sps:$4 sm:$0xff]   ;;  %v1145_v25 = vld [vmem:[#allocation8 + $0x18] ss:$12 sps:$4 sm:$0xff]  }
  0x3a   :  { %v1143_v24 = vld [vmem:[#allocation8 + $0x1c] ss:$12 sps:$4 sm:$0xff]   ;;  %v1146_v26 = vld [vmem:[#allocation8 + $0x4] ss:$12 sps:$4 sm:$0xff]   ;;  %v1148_v27 = vld [vmem:[#allocation8] ss:$12 sps:$4 sm:$0xff]  }
  0x3b   :  { %181 = vmatpush1.bf16.msra.mxu1 %v1119_v8  ;;  %779 = vmatpush1.bf16.msra.mxu0 %v1130_v15  ;;  %v1149_v28 = vld [vmem:[#allocation8 + $0x16c] ss:$12 sps:$4 sm:$0xff]   ;;  %v1151_v29 = vld [vmem:[#allocation8 + $0x168] ss:$12 sps:$4 sm:$0xff]   ;;  %v1157_v31 = vld [vmem:[#allocation8 + $0x150] ss:$12 sps:$4 sm:$0xff]  }
  0x3c   :  { %1005 = vmatprep.subr.msk.bf16.mxu1 %vm153_vm0, %v1002_v11  ;;  %780 = vmatprep.subr.bf16.mxu0 %v1131_v16  ;;  %v1152_v30 = vld [vmem:[#allocation8 + $0x154] ss:$12 sps:$4 sm:$0xff]   ;;  %v1158_v32 = vld [vmem:[#allocation8 + $0x13c] ss:$12 sps:$4 sm:$0xff]   ;;  %v1163_v33 = vld [vmem:[#allocation8 + $0x138] ss:$12 sps:$4 sm:$0xff]  }
  0x3d   :  { %v1164_v34 = vld [vmem:[#allocation8 + $0x124] ss:$12 sps:$4 sm:$0xff]   ;;  %v1169_v35 = vld [vmem:[#allocation8 + $0x120] ss:$12 sps:$4 sm:$0xff]   ;;  %v1175_v37 = vld [vmem:[#allocation8 + $0x108] ss:$12 sps:$4 sm:$0xff]  }
  0x3e   :  { %v1170_v36 = vld [vmem:[#allocation8 + $0x10c] ss:$12 sps:$4 sm:$0xff]   ;;  %v1176_v38 = vld [vmem:[#allocation8 + $0xf4] ss:$12 sps:$4 sm:$0xff]   ;;  %v1181_v39 = vld [vmem:[#allocation8 + $0xf0] ss:$12 sps:$4 sm:$0xff]  }
  0x3f   :  { %781 = vmatpush1.bf16.msra.mxu0 %v1133_v17  ;;  %v82_v40 = vld [vmem:[#allocation3] sm:$0x3]  ;;  %v1122_v45 = vld [vmem:[#allocation7 + $0x8] ss:$16 sps:$4 sm:$0xff]   ;;  %v1162_v48 = vld [vmem:[#allocation8 + $0x214] ss:$12 sps:$4 sm:$0xff]  }
  0x40   :  { %782 = vmatprep.subr.bf16.mxu0 %v1134_v18  ;;  %v1124_v44 = vld [vmem:[#allocation7 + $0xc] ss:$16 sps:$4 sm:$0xff]   ;;  %v1154_v47 = vld [vmem:[#allocation8 + $0x228] ss:$12 sps:$4 sm:$0xff]   ;;  %v1166_v51 = vld [vmem:[#allocation8 + $0x1f8] ss:$12 sps:$4 sm:$0xff]  }
  0x41   :  { %v1156_v46 = vld [vmem:[#allocation8 + $0x22c] ss:$12 sps:$4 sm:$0xff]   ;;  %v1160_v49 = vld [vmem:[#allocation8 + $0x210] ss:$12 sps:$4 sm:$0xff]   ;;  %v1178_v55 = vld [vmem:[#allocation8 + $0x1c8] ss:$12 sps:$4 sm:$0xff]  }
  0x42   :  { %v1168_v50 = vld [vmem:[#allocation8 + $0x1fc] ss:$12 sps:$4 sm:$0xff]   ;;  %v1174_v52 = vld [vmem:[#allocation8 + $0x1e4] ss:$12 sps:$4 sm:$0xff]   ;;  %v1172_v53 = vld [vmem:[#allocation8 + $0x1e0] ss:$12 sps:$4 sm:$0xff]  }
  0x43   :  { %783 = vmatpush1.bf16.msra.mxu0 %v1136_v19  ;;  %v1180_v54 = vld [vmem:[#allocation8 + $0x1cc] ss:$12 sps:$4 sm:$0xff]   ;;  %v1182_v56 = vld [vmem:[#allocation8 + $0xdc] ss:$12 sps:$4 sm:$0xff]   ;;  %v1186_v57 = vld [vmem:[#allocation8 + $0x1b4] ss:$12 sps:$4 sm:$0xff]  }
  0x44   :  { %784 = vmatprep.subr.bf16.mxu0 %v1137_v20  ;;  %v1184_v58 = vld [vmem:[#allocation8 + $0x1b0] ss:$12 sps:$4 sm:$0xff]   ;;  %v1187_v59 = vld [vmem:[#allocation8 + $0xd8] ss:$12 sps:$4 sm:$0xff]   ;;  %v1193_v63 = vld [vmem:[#allocation8 + $0xc0] ss:$12 sps:$4 sm:$0xff]  }
  0x45   :  { %v1188_v60 = vld [vmem:[#allocation8 + $0xc4] ss:$12 sps:$4 sm:$0xff]   ;;  %v1192_v61 = vld [vmem:[#allocation8 + $0x19c] ss:$12 sps:$4 sm:$0xff]   ;;  %v1194_v2 = vld [vmem:[#allocation8 + $0x180] ss:$12 sps:$4 sm:$0xff]  }
  0x46   :  { %v1190_v62 = vld [vmem:[#allocation8 + $0x198] ss:$12 sps:$4 sm:$0xff]   ;;  %v1198_v4 = vld [vmem:[#allocation8 + $0x240] ss:$12 sps:$4 sm:$0xff]   ;;  %v1202_v5 = vld [vmem:[#allocation8 + $0x170] ss:$12 sps:$4 sm:$0xff]  }
  0x47   :  { %785 = vmatpush1.bf16.msra.mxu0 %v1139_v21  ;;  %v1196_v1 = vld [vmem:[#allocation8 + $0x184] ss:$12 sps:$4 sm:$0xff]   ;;  %v1388_v7 = vshrl.u32 %v99_v6, 7  ;;  %v97_v9 = vld [vmem:[%s1444_s3] sm:$0xf]  ;;  %vm974_vm3 = vcmask 1041408  }
  0x48   :  { %786 = vmatprep.subr.bf16.mxu0 %v1140_v22  ;;  %v1200_v3 = vld [vmem:[#allocation8 + $0x244] ss:$12 sps:$4 sm:$0xff]   ;;  %vm978_vm4 = vcmask 353280   ;;  %vm986_vm5 = vcmask 1024  }
  0x49   :  { %v1391_v8 = vsub.s32 0, %v1388_v7  ;;  %v105_v10 = vsub.s32 1, %v1388_v7  ;;  %v1401_v15 = vsub.s32 2, %v1388_v7  ;;  %v113_v18 = vsub.s32 3, %v1388_v7 }
  0x4b   :  { %787 = vmatpush1.bf16.msra.mxu0 %v1142_v23  ;;  %v102_v11 = vrot.slane %v97_v9, %v1391_v8  ;;  %v110_v22 = vrot.slane %v97_v9, %v1401_v15 }
  0x4c   :  { %788 = vmatprep.subr.bf16.mxu0 %v1143_v24 }
  0x4f   :  { %789 = vmatpush1.bf16.msra.mxu0 %v1145_v25  ;;  %v114_v25 = vrot.slane %v97_v9, %v113_v18 }
  0x50   :  { %790 = vmatprep.subr.bf16.mxu0 %v1146_v26  ;;  %v1197_v26 = vld [vmem:[#allocation8 + $0x230] ss:$12 sps:$4 sm:$0xff]  }
  0x53   :  { %791 = vmatpush1.bf16.msra.mxu0 %v1148_v27 }
  0x54   :  { %792 = vmatprep.subr.bf16.mxu0 %v1149_v28 }
  0x57   :  { %793 = vmatpush2.bf16.msra.mxu0 %v1151_v29 }
  0x58   :  { %794 = vmatprep.subr.bf16.mxu0 %v1152_v30 }
  0x5b   :  { %795 = vmatpush2.bf16.msra.mxu0 %v1157_v31 }
  0x5c   :  { %796 = vmatprep.subr.bf16.mxu0 %v1158_v32  ;;  %v1201_v32 = vld [vmem:[#allocation8 + $0x218] ss:$12 sps:$4 sm:$0xff]  }
  0x5f   :  { %797 = vmatpush2.bf16.msra.mxu0 %v1163_v33 }
  0x60   :  { %798 = vmatprep.subr.bf16.mxu0 %v1164_v34 }
  0x63   :  { %799 = vmatpush2.bf16.msra.mxu0 %v1169_v35 }
  0x64   :  { %800 = vmatprep.subr.bf16.mxu0 %v1170_v36 }
  0x67   :  { %801 = vmatpush2.bf16.msra.mxu0 %v1175_v37 }
  0x68   :  { %802 = vmatprep.subr.bf16.mxu0 %v1176_v38  ;;  %v1203_v38 = vld [vmem:[#allocation8 + $0xb0] ss:$12 sps:$4 sm:$0xff]  }
  0x6b   :  { %803 = vmatpush2.bf16.msra.mxu0 %v1181_v39  ;;  %v1204_v39 = vld [vmem:[#allocation8 + $0x200] ss:$12 sps:$4 sm:$0xff]  }
  0x6c   :  { %804 = vmatprep.subr.bf16.mxu0 %v1182_v56  ;;  %v1220_v56 = vld [vmem:[#allocation8 + $0xe0] ss:$12 sps:$4 sm:$0xff]  }
  0x6f   :  { %805 = vmatpush2.bf16.msra.mxu0 %v1187_v59  ;;  %v1223_v59 = vld [vmem:[#allocation8 + $0xc8] ss:$12 sps:$4 sm:$0xff]  }
  0x70   :  { %806 = vmatprep.subr.bf16.mxu0 %v1188_v60  ;;  %v1224_v60 = vld [vmem:[#allocation8 + $0x8] ss:$12 sps:$4 sm:$0xff]  }
  0x73   :  { %807 = vmatpush2.bf16.msra.mxu0 %v1193_v63 }
  0x74   :  { %898 = vmatprep.subr.bf16.mxu0 %v1319_v0 }
  0xa6   :  { %v86_v41 = vpop.permute.xlu0 %85 }
  0xa7   :  { %v89_v42 = vsel %vm88_vm1, %v82_v40, %v86_v41  ;;  %v1205_v41 = vld [vmem:[#allocation8 + $0x158] ss:$12 sps:$4 sm:$0xff]  }
  0xa8   :  { %v90_v43 = vpack.c.bf16 %v89_v42, %v89_v42  ;;  %v1206_v42 = vld [vmem:[#allocation8 + $0x98] ss:$12 sps:$4 sm:$0xff]  }
  0xaa   :  { %1004 = vmatmul.mubr.msk.bf16.vlgmr.msra.gmra.mxu1 %vm149_vm2, %v90_v43 }
  0xab   :  { %220 = vmatpush1.bf16.msra.mxu1 %v1381_v12  ;;  %239 = vmatprep.mubr.bf16.mxu1 %v1319_v0  ;;  %v106_v12 = vrot.slane %v97_v9, %v105_v10  ;;  %v941_v9 = vld [vmem:[%s1447_s6] sm:$0x7] }
  0xac   :  { %221 = vmatprep.subr.bf16.mxu1 %v1124_v44  ;;  %v1208_v44 = vld [vmem:[#allocation8 + $0x140] ss:$12 sps:$4 sm:$0xff]  }
  0xaf   :  { %222 = vmatpush1.bf16.msra.mxu1 %v1122_v45  ;;  %v1209_v45 = vld [vmem:[#allocation8 + $0x80] ss:$12 sps:$4 sm:$0xff]  }
  0xb0   :  { %817 = vmatprep.subr.bf16.mxu1 %v1156_v46  ;;  %v1210_v46 = vld [vmem:[#allocation8 + $0x1d0] ss:$12 sps:$4 sm:$0xff]  }
  0xb2   :  { %1006 = vmatmul.mubr.msk.bf16.vlgmr.msra.gmra.mxu1 %vm149_vm2, %v90_v43  ;;  %v1207_v43 = vld [vmem:[#allocation8 + $0x1e8] ss:$12 sps:$4 sm:$0xff]  }
  0xb3   :  { %818 = vmatpush1.bf16.msra.mxu1 %v1154_v47  ;;  %v1211_v47 = vld [vmem:[#allocation8 + $0x128] ss:$12 sps:$4 sm:$0xff]  }
  0xb4   :  { %819 = vmatprep.subr.bf16.mxu1 %v1162_v48  ;;  %v1212_v48 = vld [vmem:[#allocation8 + $0x68] ss:$12 sps:$4 sm:$0xff]  }
  0xb7   :  { %820 = vmatpush1.bf16.msra.mxu1 %v1160_v49  ;;  %v1213_v49 = vld [vmem:[#allocation8 + $0x1b8] ss:$12 sps:$4 sm:$0xff]  }
  0xb8   :  { %821 = vmatprep.subr.bf16.mxu1 %v1168_v50  ;;  %v1214_v50 = vld [vmem:[#allocation8 + $0x110] ss:$12 sps:$4 sm:$0xff]  }
  0xbb   :  { %822 = vmatpush1.bf16.msra.mxu1 %v1166_v51  ;;  %v1215_v51 = vld [vmem:[#allocation8 + $0x50] ss:$12 sps:$4 sm:$0xff]  }
  0xbc   :  { %823 = vmatprep.subr.bf16.mxu1 %v1174_v52  ;;  %v1216_v52 = vld [vmem:[#allocation8 + $0x1a0] ss:$12 sps:$4 sm:$0xff]  }
  0xbf   :  { %824 = vmatpush1.bf16.msra.mxu1 %v1172_v53  ;;  %v1217_v53 = vld [vmem:[#allocation8 + $0xf8] ss:$12 sps:$4 sm:$0xff]  }
  0xc0   :  { %825 = vmatprep.subr.bf16.mxu1 %v1180_v54  ;;  %v1218_v54 = vld [vmem:[#allocation8 + $0x38] ss:$12 sps:$4 sm:$0xff]  }
  0xc3   :  { %826 = vmatpush1.bf16.msra.mxu1 %v1178_v55  ;;  %v1219_v55 = vld [vmem:[#allocation8 + $0x188] ss:$12 sps:$4 sm:$0xff]  }
  0xc4   :  { %827 = vmatprep.subr.bf16.mxu1 %v1186_v57  ;;  %v1221_v57 = vld [vmem:[#allocation8 + $0x20] ss:$12 sps:$4 sm:$0xff]  }
  0xc7   :  { %828 = vmatpush1.bf16.msra.mxu1 %v1184_v58  ;;  %v1222_v58 = vld [vmem:[#allocation8 + $0x248] ss:$12 sps:$4 sm:$0xff]  }
  0xc8   :  { %829 = vmatprep.subr.bf16.mxu1 %v1192_v61 }
  0xcb   :  { %830 = vmatpush1.bf16.msra.mxu1 %v1190_v62 }
  0xcc   :  { %831 = vmatprep.subr.bf16.mxu1 %v1196_v1 }
  0xcf   :  { %832 = vmatpush1.bf16.msra.mxu1 %v1194_v2 }
  0xd0   :  { %847 = vmatprep.subr.bf16.mxu1 %v1200_v3 }
  0xd3   :  { %848 = vmatpush2.bf16.msra.mxu1 %v1198_v4 }
  0xd4   :  { %1084 = vmatprep.subr.bf16.mxu1 %v1202_v5 }
 0x16a   :  { %v200_v13 = vpop.f32.mrf.mxu1 }
 0x16b   :  { %v201_v14 = vadd.f32 %v200_v13, %v102_v11  ;;  %v942_v13 = vunpack.c.l.bf16 %v941_v9 }
 0x16c   :  { %v202_v16 = vpop.f32.mrf.mxu1 }
 0x16d   :  { %v203_v17 = vadd.f32 %v202_v16, %v106_v12  ;;  %v248_v19 = vmax.f32 %v201_v14, 0.0  ;;  %v951_v18 = vrot.slane %v942_v13, %v1401_v15 }
 0x16e   :  { %v204_v20 = vpop.f32.mrf.mxu1 }
 0x16f   :  { %v249_v21 = vmax.f32 %v203_v17, 0.0  ;;  %v1405_v27 = vpack.c.bf16 %v248_v19, %v248_v19 }
 0x170   :  { %v205_v23 = vpop.f32.mrf.mxu1 }
 0x171   :  { %v253_v24 = vpack.c.bf16 %v249_v21, %v249_v21  ;;  %v947_v21 = vrot.slane %v942_v13, %v1391_v8 }
 0x172   :  { %v241_v28 = vpop.f32.mrf.mxu1 }
 0x173   :  { %v242_v29 = vadd.f32 %v241_v28, %v110_v22  ;;  %808 = vmatprep.mubr.bf16.mxu0 %v253_v24  ;;  %v954_v22 = vsub.s32 4, %v1388_v7 }
 0x174   :  { %v243_v30 = vpop.f32.mrf.mxu1  ;;  %809 = vmatmul.mubr.bf16.vlgmr.msra.gmra.mxu0 %v1405_v27 }
 0x175   :  { %v244_v31 = vadd.f32 %v243_v30, %v114_v25  ;;  %899 = vmatpush1.bf16.msra.mxu0 %v1197_v26  ;;  %v250_v33 = vmax.f32 %v242_v29, 0.0  ;;  %v966_v25 = vrot.slane %v951_v18, %v1391_v8  ;;  %v962_v30 = vrot.slane %v947_v21, %v1391_v8 }
 0x176   :  { %v245_v34 = vpop.f32.mrf.mxu1  ;;  %900 = vmatprep.subr.bf16.mxu0 %v1319_v0 }
 0x177   :  { %v251_v35 = vmax.f32 %v244_v31, 0.0  ;;  %v254_v40 = vpack.c.bf16 %v250_v33, %v250_v33 }
 0x178   :  { %v246_v36 = vpop.f32.mrf.mxu1 }
 0x179   :  { %v255_v37 = vpack.c.bf16 %v251_v35, %v251_v35  ;;  %901 = vmatpush1.bf16.msra.mxu0 %v1201_v32  ;;  %v955_v32 = vrot.slane %v942_v13, %v954_v22 }
 0x17a   :  { %902 = vmatprep.subr.bf16.mxu0 %v1319_v0 }
 0x17b   :  { %1082 = vmatprep.mubr.msk.bf16.mxu1 %vm88_vm1, %v255_v37  ;;  %1083 = vmatprep.mubr.msk.bf16.mxu0 %vm88_vm1, %v255_v37 }
 0x17c   :  { %850 = vmatmul.mubr.bf16.vlgmr.msra.gmra.mxu1 %v254_v40 }
 0x17d   :  { %1085 = vmatpush3.bf16.msra.mxu1 %v1203_v38  ;;  %903 = vmatpush1.bf16.msra.mxu0 %v1204_v39  ;;  %v970_v38 = vrot.slane %v955_v32, %v1391_v8 }
 0x17e   :  { %890 = vmatprep.mubr.bf16.mxu1 %v253_v24  ;;  %1086 = vmatprep.subr.bf16.mxu1 %v1205_v41 }
 0x17f   :  { %904 = vmatprep.subr.bf16.mxu0 %v1319_v0 }
 0x181   :  { %1087 = vmatpush3.bf16.msra.mxu1 %v1206_v42  ;;  %905 = vmatpush1.bf16.msra.mxu0 %v1207_v43 }
 0x182   :  { %1088 = vmatprep.subr.bf16.mxu1 %v1208_v44  ;;  %906 = vmatprep.subr.bf16.mxu0 %v1319_v0 }
 0x185   :  { %1089 = vmatpush3.bf16.msra.mxu1 %v1209_v45  ;;  %907 = vmatpush1.bf16.msra.mxu0 %v1210_v46  ;;  %v984_v45 = vstv %s1448_s7 }
 0x186   :  { %1090 = vmatprep.subr.bf16.mxu1 %v1211_v47  ;;  %908 = vmatprep.subr.bf16.mxu0 %v1319_v0 }
 0x189   :  { %1091 = vmatpush3.bf16.msra.mxu1 %v1212_v48  ;;  %909 = vmatpush1.bf16.msra.mxu0 %v1213_v49 }
 0x18a   :  { %1092 = vmatprep.subr.bf16.mxu1 %v1214_v50  ;;  %910 = vmatprep.subr.bf16.mxu0 %v1319_v0 }
 0x18d   :  { %1093 = vmatpush3.bf16.msra.mxu1 %v1215_v51  ;;  %911 = vmatpush1.bf16.msra.mxu0 %v1216_v52 }
 0x18e   :  { %1094 = vmatprep.subr.bf16.mxu1 %v1217_v53  ;;  %912 = vmatprep.subr.bf16.mxu0 %v1319_v0 }
 0x191   :  { %1095 = vmatpush3.bf16.msra.mxu1 %v1218_v54  ;;  %913 = vmatpush1.bf16.msra.mxu0 %v1219_v55 }
 0x192   :  { %1096 = vmatprep.subr.bf16.mxu1 %v1220_v56  ;;  %928 = vmatprep.subr.bf16.mxu0 %v1319_v0  ;;  %v356_v0 = vld [vmem:[%s1446_s5] sm:$0x7] }
 0x193   :  { %v365_v6 = vrot.slane %v356_v0, %v105_v10  ;;  %v361_v11 = vrot.slane %v356_v0, %v1391_v8  ;;  %v369_v26 = vrot.slane %v356_v0, %v1401_v15 }
 0x195   :  { %1097 = vmatpush3.bf16.msra.mxu1 %v1221_v57  ;;  %929 = vmatpush2.bf16.msra.mxu0 %v1222_v58 }
 0x196   :  { %1098 = vmatprep.subr.bf16.mxu1 %v1223_v59 }
 0x198   :  { %931 = vmatmul.mubr.bf16.vlgmr.msra.gmra.mxu0 %v254_v40 }
 0x199   :  { %1099 = vmatpush3.bf16.msra.mxu1 %v1224_v60 }
 0x19c   :  { %891 = vmatmul.mubr.bf16.vlgmr.msra.gmra.mxu1 %v1405_v27 }
 0x234   :  { %v810_v61 = vpop.f32.mrf.mxu0 }
 0x235   :  { %v811_v16 = vadd.f32 %v810_v61, %v361_v11 }
 0x236   :  { %v812_v62 = vpop.f32.mrf.mxu0 }
 0x237   :  { %v813_v12 = vadd.f32 %v812_v62, %v365_v6 }
 0x238   :  { %v814_v63 = vpop.f32.mrf.mxu0 }
 0x23a   :  { %v815_v1 = vpop.f32.mrf.mxu0 }
 0x23c   :  { %v851_v2 = vpop.f32.mrf.mxu1 }
 0x23d   :  { %v852_v20 = vadd.f32 %v851_v2, %v811_v16 }
 0x23e   :  { %v853_v3 = vpop.f32.mrf.mxu1 }
 0x23f   :  { %v854_v17 = vadd.f32 %v853_v3, %v813_v12  ;;  %v938_v29 = vmax.f32 %v852_v20, 0.0 }
 0x240   :  { %v855_v4 = vpop.f32.mrf.mxu1 }
 0x241   :  { %v939_v24 = vmax.f32 %v854_v17, 0.0  ;;  %v971_v37 = vmul.f32 %v962_v30, %v938_v29 }
 0x242   :  { %v856_v5 = vpop.f32.mrf.mxu1 }
 0x243   :  { %v972_v34 = vmul.f32 %v966_v25, %v939_v24  ;;  %v975_v41 = vsel %vm974_vm3, %v971_v37, 0.0 }
 0x245   :  { %v976_v40 = vsel %vm974_vm3, %v972_v34, 0.0 }
 0x246   :  { %v977_v42 = vadd.f32 %v976_v40, %v975_v41 }
 0x258   :  { %v932_v14 = vpop.f32.mrf.mxu0 }
 0x25a   :  { %v934_v19 = vpop.f32.mrf.mxu0 }
 0x25c   :  { %v1100_v10 = vpop.f32.mrf.mxu1  ;;  %v935_v23 = vpop.f32.mrf.mxu0 }
 0x25e   :  { %v1101_v27 = vpop.f32.mrf.mxu1  ;;  %v936_v28 = vpop.f32.mrf.mxu0 }
 0x25f   :  { %v1102_v31 = vadd.f32 %v1101_v27, %v1100_v10 }
 0x260   :  { %v1103_v33 = vpop.f32.mrf.mxu1 }
 0x261   :  { %v893_v35 = vadd.f32 %v1102_v31, %v369_v26 }
 0x262   :  { %v1104_v36 = vpop.f32.mrf.mxu1 }
 0x263   :  { %v933_v7 = vadd.f32 %v932_v14, %v893_v35 }
 0x265   :  { %v940_v39 = vmax.f32 %v933_v7, 0.0 }
 0x267   :  { %v973_v15 = vmul.f32 %v970_v38, %v940_v39 }
 0x269   :  { %v979_v43 = vsel %vm978_vm4, %v973_v15, 0.0 }
 0x26a   :  { %v980_v44 = vadd.f32 %v979_v43, %v977_v42 }
 0x26c   :  { %981 = vadd.xlane.f32.xlu0 %v980_v44 }
 0x2f5   :  { %v982_v46 = vpop.xlane.xlu0 %981 }
 0x2f6   :  { %v985_v47 = vadd.f32 %v984_v45, %v982_v46 }
 0x2f8   :  { %987 = vst.msk [vmem:[%s1449_s8] sm:$0x3] %vm986_vm5, %v985_v47 }
 0x2f9   :  { %992 = vsyncpa [#allocation4], 1 }
 0x2fa   :  { %993 = vsyncpa [#allocation6], 1 }
 0x2fb   :  { %994 = vsyncpa [#allocation9], 1 }

</bundles_post_ra>
